<compile_context>
chip_gen: v5e
topology: v5e:2x2
jax: 0.10.0
libtpu: 0.0.40
codegen_flags: <defaults>
</compile_context>

<pallas_src>
import functools

import jax
import jax.numpy as jnp
from jax.experimental import pallas as pl
from jax.experimental.pallas import tpu as pltpu


def _ca_pa_kernel(x_ref, ca_ref, w1_ref, b1_ref, w2_ref, b2_ref, o_ref):
    # x_ref:  (1, C, TM)   channel-major pixel tile (pixels on the lane axis)
    # ca_ref: (1, C, 1)    per-(batch, channel) CA scale, broadcasts over lanes
    # w1_ref: (Cmid, C)    PA conv1 weight (1x1 conv == dense over channels)
    # b1_ref: (Cmid, 1)    PA conv1 bias (broadcasts over lanes)
    # w2_ref: (Cmid, 1)    PA conv2 weight (broadcasts over lanes)
    # b2_ref: (1, 1)       PA conv2 bias, in SMEM
    # o_ref:  (1, C, TM)   xc * pixel-attention, lane-dense
    xc = x_ref[0].astype(jnp.float32) * ca_ref[0]                       # (C, TM)

    # PA conv1: C -> Cmid on the MXU, f32 accumulation.
    h = jnp.dot(w1_ref[...], xc, preferred_element_type=jnp.float32)    # (Cmid, TM)
    h = jnp.maximum(h + b1_ref[...], 0.0)

    # PA conv2: Cmid -> 1.  Tiny contraction -> keep it off the MXU: VPU
    # broadcast-multiply + sublane reduce (XLU), which rides in slack.
    z = jnp.sum(h * w2_ref[...], axis=0, keepdims=True) + b2_ref[0, 0]  # (1, TM)
    pa = jax.nn.sigmoid(z)                                              # (1, TM)

    # Apply the pixel attention in-kernel (fused x*y of PALayer.forward).
    o_ref[0] = (xc * pa).astype(o_ref.dtype)


def _pick_tile(hw, batch, want):
    """Pick a legal, lane-aligned pixel tile; keep >= 4 grid steps (v7x)."""
    if want >= hw:
        tile = hw                                  # full extent: always legal
    else:
        tile = max(128, (want // 128) * 128)       # multiple of the lane width
    # Keep enough grid steps for megacore sharding and pipeline depth.
    while batch * ((hw + tile - 1) // tile) < 4 and tile > 128:
        nxt = max(128, ((tile + 1) // 2 // 128) * 128)
        if nxt == tile:
            break
        tile = nxt
    return tile


@functools.partial(jax.jit, static_argnames=("tile_hw",))
def ca_pa_forward(x, ca_scale, pa_w1, pa_b1, pa_w2, pa_b2, *, tile_hw=1024):
    """Fused CALayer-apply + PALayer forward.

    x:        [B, C, H, W]  (NCHW)
    ca_scale: [B, C]        sigmoid channel-attention scale (CALayer head)
    pa_w1:    [Cmid, C], pa_b1: [Cmid], pa_w2: [Cmid], pa_b2: scalar

    Returns (x * ca) * sigmoid(conv2(relu(conv1(x * ca)))) : [B, C, H, W].
    """
    B, C, H, W = x.shape
    Cmid = pa_w1.shape[0]
    HW = H * W

    # Free channel-major view of NCHW — no transpose, no pad.
    x_cm = x.reshape(B, C, HW)
    ca3 = ca_scale.reshape(B, C, 1).astype(jnp.float32)
    w1_2d = pa_w1.reshape(Cmid, C).astype(jnp.float32)
    b1_2d = pa_b1.reshape(Cmid, 1).astype(jnp.float32)
    w2_2d = pa_w2.reshape(Cmid, 1).astype(jnp.float32)
    b2_2d = jnp.asarray(pa_b2, jnp.float32).reshape(1, 1)

    tm = _pick_tile(HW, B, tile_hw)
    grid = (B, pl.cdiv(HW, tm))

    out = pl.pallas_call(
        _ca_pa_kernel,
        out_shape=jax.ShapeDtypeStruct((B, C, HW), x.dtype),
        grid_spec=pltpu.PrefetchScalarGridSpec(
            num_scalar_prefetch=0,
            grid=grid,
            in_specs=[
                pl.BlockSpec((1, C, tm), lambda b, j: (b, 0, j)),
                pl.BlockSpec((1, C, 1), lambda b, j: (b, 0, 0)),
                pl.BlockSpec((Cmid, C), lambda b, j: (0, 0)),
                pl.BlockSpec((Cmid, 1), lambda b, j: (0, 0)),
                pl.BlockSpec((Cmid, 1), lambda b, j: (0, 0)),
                pl.BlockSpec(memory_space=pltpu.MemorySpace.SMEM),
            ],
            out_specs=pl.BlockSpec((1, C, tm), lambda b, j: (b, 0, j)),
        ),
        compiler_params=pltpu.CompilerParams(
            dimension_semantics=("parallel", "parallel"),
            vmem_limit_bytes=32 * 1024 * 1024,   # above v5e's 16 MiB scoped default
        ),
    )(x_cm, ca3, w1_2d, b1_2d, w2_2d, b2_2d)

    return out.reshape(B, C, H, W)


def ca_channel_scale(x, ca_w1, ca_b1, ca_w2, ca_b2):
    """CALayer attention head: sigmoid channel scale of shape [B, C].

    TODO(synk): global avg-pool + the (B, C)-sized MLP are O(B*C) work and are
    left to XLA rather than expressed as a Pallas kernel.
    """
    y = jnp.mean(x.astype(jnp.float32), axis=(2, 3))          # (B, C)
    h = jnp.maximum(y @ ca_w1.T + ca_b1, 0.0)                 # (B, Cmid)
    return jax.nn.sigmoid(h @ ca_w2.T + ca_b2)                # (B, C)


def ca_pa_ref(x, ca_scale, pa_w1, pa_b1, pa_w2, pa_b2):
    """Pure-JAX reference for the fused CALayer-apply + PALayer path."""
    xc = x * ca_scale[:, :, None, None]
    h = jnp.einsum("bchw,mc->bmhw", xc, pa_w1) + pa_b1.reshape(1, -1, 1, 1)
    h = jnp.maximum(h, 0.0)
    z = jnp.einsum("bmhw,m->bhw", h, pa_w2.reshape(-1)) + jnp.reshape(pa_b2, ())
    return xc * jax.nn.sigmoid(z)[:, None, :, :]


if __name__ == "__main__":
    # channel must be >= 8 so that channel // 8 >= 1 (as in the PyTorch module).
    B, C, H, W = 2, 32, 16, 16
    Cmid = C // 8

    key = jax.random.PRNGKey(0)
    kx, k1, k2, k3, k4, k5, k6, k7, k8 = jax.random.split(key, 9)

    x = jax.random.normal(kx, (B, C, H, W), dtype=jnp.float32)

    # Deterministic synthetic parameters (PyTorch 1x1 conv weights squeezed).
    ca_w1 = jax.random.normal(k1, (Cmid, C), dtype=jnp.float32) * 0.1
    ca_b1 = jax.random.normal(k2, (Cmid,), dtype=jnp.float32) * 0.1
    ca_w2 = jax.random.normal(k3, (C, Cmid), dtype=jnp.float32) * 0.1
    ca_b2 = jax.random.normal(k4, (C,), dtype=jnp.float32) * 0.1
    pa_w1 = jax.random.normal(k5, (Cmid, C), dtype=jnp.float32) * 0.1
    pa_b1 = jax.random.normal(k6, (Cmid,), dtype=jnp.float32) * 0.1
    pa_w2 = jax.random.normal(k7, (Cmid,), dtype=jnp.float32) * 0.1
    pa_b2 = jax.random.normal(k8, (), dtype=jnp.float32) * 0.1

    ca = ca_channel_scale(x, ca_w1, ca_b1, ca_w2, ca_b2)       # (B, C) in XLA

    y = ca_pa_forward(x, ca, pa_w1, pa_b1, pa_w2, pa_b2)
    y = jax.block_until_ready(y)

    y_ref = ca_pa_ref(x, ca, pa_w1, pa_b1, pa_w2, pa_b2)
    assert y.shape == (B, C, H, W), y.shape
    assert jnp.allclose(y, y_ref, atol=1e-5, rtol=1e-5), "mismatch vs reference"

    print("KERNEL_OK")
</pallas_src>

<mosaic_0001>
module attributes {stable_mosaic.version = 11 : i64} {
  func.func @_ca_pa_kernel(%arg0: i32, %arg1: i32, %arg2: memref<1x32x128xf32, #tpu.memory_space<vmem>>, %arg3: memref<1x32x1xf32, #tpu.memory_space<vmem>>, %arg4: memref<4x32xf32, #tpu.memory_space<vmem>>, %arg5: memref<4x1xf32, #tpu.memory_space<vmem>>, %arg6: memref<4x1xf32, #tpu.memory_space<vmem>>, %arg7: memref<1x1xf32, #tpu.memory_space<smem>>, %arg8: memref<1x32x128xf32, #tpu.memory_space<vmem>>) attributes {dimension_semantics = [#tpu.dimension_semantics<parallel>, #tpu.dimension_semantics<parallel>], iteration_bounds = array<i64: 2, 2>, scalar_prefetch = 0 : i64, scratch_operands = 0 : i64, tpu.core_type = #tpu.core_type<tc>, window_params = [{transform_indices = @transform_0, window_bounds = array<i64: 1, 32, 128>}, {transform_indices = @transform_1, window_bounds = array<i64: 1, 32, 1>}, {pipeline_mode = #tpu.pipeline_mode<synchronous>, transform_indices = @transform_2, window_bounds = array<i64: 4, 32>}, {pipeline_mode = #tpu.pipeline_mode<synchronous>, transform_indices = @transform_3, window_bounds = array<i64: 4, 1>}, {pipeline_mode = #tpu.pipeline_mode<synchronous>, transform_indices = @transform_4, window_bounds = array<i64: 4, 1>}, {transform_indices = @transform_5, window_bounds = array<i64: 1, 1>}, {transform_indices = @transform_6, window_bounds = array<i64: 1, 32, 128>}]} {
    %c0 = arith.constant 0 : index
    %c0_0 = arith.constant 0 : index
    %c0_1 = arith.constant 0 : index
    %0 = vector.load %arg2[%c0, %c0_0, %c0_1] : memref<1x32x128xf32, #tpu.memory_space<vmem>>, vector<1x32x128xf32>
    %1 = vector.shape_cast %0 : vector<1x32x128xf32> to vector<32x128xf32>
    %c0_2 = arith.constant 0 : index
    %c0_3 = arith.constant 0 : index
    %c0_4 = arith.constant 0 : index
    %2 = vector.load %arg3[%c0_2, %c0_3, %c0_4] : memref<1x32x1xf32, #tpu.memory_space<vmem>>, vector<1x32x1xf32>
    %3 = vector.shape_cast %2 : vector<1x32x1xf32> to vector<32x1xf32>
    %4 = vector.broadcast %3 : vector<32x1xf32> to vector<32x128xf32>
    %5 = arith.mulf %1, %4 : vector<32x128xf32>
    %c0_5 = arith.constant 0 : index
    %c0_6 = arith.constant 0 : index
    %6 = vector.load %arg4[%c0_5, %c0_6] : memref<4x32xf32, #tpu.memory_space<vmem>>, vector<4x32xf32>
    %cst = arith.constant dense<0.000000e+00> : vector<4x128xf32>
    %7 = tpu.matmul %6, %5, %cst {dimension_numbers = #tpu.dot_dimension_numbers<[1], [0], [0], [1], [0, 0, 1, 1], [], []>} : vector<4x32xf32>, vector<32x128xf32>, vector<4x128xf32> -> vector<4x128xf32>
    %c0_7 = arith.constant 0 : index
    %c0_8 = arith.constant 0 : index
    %8 = vector.load %arg5[%c0_7, %c0_8] : memref<4x1xf32, #tpu.memory_space<vmem>>, vector<4x1xf32>
    %9 = vector.broadcast %8 : vector<4x1xf32> to vector<4x128xf32>
    %10 = arith.addf %7, %9 : vector<4x128xf32>
    %cst_9 = arith.constant 0.000000e+00 : f32
    %11 = vector.broadcast %cst_9 : f32 to vector<4x128xf32>
    %12 = arith.maximumf %10, %11 : vector<4x128xf32>
    %c0_10 = arith.constant 0 : index
    %c0_11 = arith.constant 0 : index
    %13 = vector.load %arg6[%c0_10, %c0_11] : memref<4x1xf32, #tpu.memory_space<vmem>>, vector<4x1xf32>
    %14 = vector.broadcast %13 : vector<4x1xf32> to vector<4x128xf32>
    %15 = arith.mulf %12, %14 : vector<4x128xf32>
    %cst_12 = arith.constant dense<0.000000e+00> : vector<128xf32>
    %16 = vector.multi_reduction <add>, %15, %cst_12 [0] : vector<4x128xf32> to vector<128xf32>
    %17 = vector.shape_cast %16 : vector<128xf32> to vector<1x128xf32>
    %c0_13 = arith.constant 0 : index
    %c0_14 = arith.constant 0 : index
    %18 = memref.load %arg7[%c0_13, %c0_14] : memref<1x1xf32, #tpu.memory_space<smem>>
    %19 = vector.broadcast %18 : f32 to vector<1x128xf32>
    %20 = arith.addf %17, %19 : vector<1x128xf32>
    %21 = arith.negf %20 : vector<1x128xf32>
    %22 = math.exp %21 : vector<1x128xf32>
    %cst_15 = arith.constant 1.000000e+00 : f32
    %23 = vector.broadcast %cst_15 : f32 to vector<1x128xf32>
    %24 = arith.addf %23, %22 : vector<1x128xf32>
    %25 = arith.divf %23, %24 : vector<1x128xf32>
    %26 = vector.broadcast %25 : vector<1x128xf32> to vector<32x128xf32>
    %27 = arith.mulf %5, %26 : vector<32x128xf32>
    %c0_16 = arith.constant 0 : index
    %c0_17 = arith.constant 0 : index
    %c0_18 = arith.constant 0 : index
    %28 = vector.load %arg8[%c0_16, %c0_17, %c0_18] : memref<1x32x128xf32, #tpu.memory_space<vmem>>, vector<1x32x128xf32>
    %29 = vector.shape_cast %28 : vector<1x32x128xf32> to vector<32x128xf32>
    %30 = vector.shape_cast %27 : vector<32x128xf32> to vector<1x32x128xf32>
    tpu.vector_store %arg8[%c0_16, %c0_17, %c0_18], %30 {strides = array<i32>} : memref<1x32x128xf32, #tpu.memory_space<vmem>>, vector<1x32x128xf32>,
    return
  }
  func.func @transform_0(%arg0: i32, %arg1: i32) -> (i32, i32, i32) {
    %c0_i32 = arith.constant 0 : i32
    %c0_i32_0 = arith.constant 0 : i32
    return %arg0, %c0_i32, %arg1 : i32, i32, i32
  }
  func.func @transform_1(%arg0: i32, %arg1: i32) -> (i32, i32, i32) {
    %c0_i32 = arith.constant 0 : i32
    %c0_i32_0 = arith.constant 0 : i32
    %c0_i32_1 = arith.constant 0 : i32
    return %arg0, %c0_i32, %c0_i32_0 : i32, i32, i32
  }
  func.func @transform_2(%arg0: i32, %arg1: i32) -> (i32, i32) {
    %c0_i32 = arith.constant 0 : i32
    %c0_i32_0 = arith.constant 0 : i32
    %c0_i32_1 = arith.constant 0 : i32
    return %c0_i32, %c0_i32_0 : i32, i32
  }
  func.func @transform_3(%arg0: i32, %arg1: i32) -> (i32, i32) {
    %c0_i32 = arith.constant 0 : i32
    %c0_i32_0 = arith.constant 0 : i32
    %c0_i32_1 = arith.constant 0 : i32
    return %c0_i32, %c0_i32_0 : i32, i32
  }
  func.func @transform_4(%arg0: i32, %arg1: i32) -> (i32, i32) {
    %c0_i32 = arith.constant 0 : i32
    %c0_i32_0 = arith.constant 0 : i32
    %c0_i32_1 = arith.constant 0 : i32
    return %c0_i32, %c0_i32_0 : i32, i32
  }
  func.func @transform_5(%arg0: i32, %arg1: i32) -> (i32, i32) {
    %c0_i32 = arith.constant 0 : i32
    %c0_i32_0 = arith.constant 0 : i32
    %c0_i32_1 = arith.constant 0 : i32
    return %c0_i32, %c0_i32_0 : i32, i32
  }
  func.func @transform_6(%arg0: i32, %arg1: i32) -> (i32, i32, i32) {
    %c0_i32 = arith.constant 0 : i32
    %c0_i32_0 = arith.constant 0 : i32
    return %arg0, %c0_i32, %arg1 : i32, i32, i32
  }
}

</mosaic_0001>

<bundles_post_ra>
// kernel: ca_pa_forward.1
= control target key start
LH: loop header
LB: loop body
LE: loop exit
PB: predicated region body
PF: predicated region fallthrough
CT: control target
= control target key end

     0   :  { %s874_s0 = inlined_call_operand.vmem [shape: f32[2,32,256], index: 0, kind: input, shape index: {}]   ;;  %s875_s1 = inlined_call_operand.vmem [shape: f32[2,32,1], index: 1, kind: input, shape index: {}]   ;;  %s876_s2 = inlined_call_operand.vmem [shape: f32[4,32], index: 2, kind: input, shape index: {}]   ;;  %s877_s3 = inlined_call_operand.vmem [shape: f32[4,1], index: 3, kind: input, shape index: {}]   ;;  %s878_s4 = inlined_call_operand.vmem [shape: f32[4,1], index: 4, kind: input, shape index: {}]   ;;  %s879_s5 = inlined_call_operand.<no memory space> [shape: f32[1,1], index: 5, kind: input, shape index: {}]   ;;  %s880_s6 = inlined_call_operand.vmem [shape: f32[2,32,256], index: 6, kind: output, shape index: {}]  }
   0x1   :  { %11 = sst [smem:[#allocation2]] %s879_s5 }
   0x2   :  { %s760_s23 = smov 0   ;;  %s762_s24 = smov 0  }
   0x3   :  { %s764_s25 = smov 0   ;;  %s766_s26 = smov 0  }
   0x4   :  { %s768_s27 = smov 0   ;;  %s770_s28 = smov 0  }
   0x5   :  { %s772_s29 = smov 0  }
   0x6 LB: > { %s26_s5 = sadd.s32 1, %s711_s27  ;;  %s29_s30 = sadd.s32 1, %s715_s28  ;;  %s719_s29 = sphi %s772_s29, %s17_s29   ;;  %s715_s28 = sphi %s770_s28, %s887_s28   ;;  %s711_s27 = sphi %s768_s27, %s886_s27   ;;  %s707_s26 = sphi %s766_s26, %s885_s26   ;;  %s703_s25 = sphi %s764_s25, %s884_s25   ;;  %s699_s24 = sphi %s762_s24, %s883_s24   ;;  %s695_s23 = sphi %s760_s23, %s882_s23  }
   0x7   : > { %p27_p0 = scmp.ge.s32.totalorder %s26_s5, 2  ;;  %s581_s7 = sadd.s32 4294967295, %s719_s29  }
   0x8   : > { %p45_p1 = scmp.ne.s32.totalorder %s699_s24, %s695_s23  ;;  %p46_p2 = scmp.eq.s32.totalorder %s719_s29, 0 }
   0x9   : > { %s889_s5 = smov (%p27_p0, %s26_s5), 0  ;;  %s891_s30 = smov (!%p27_p0, %s29_s30), %s715_s28 }
   0xa   : > { %p31_p3 = scmp.ge.s32.totalorder %s891_s30, 2  ;;  %p187_p4 = scmp.eq.s32.totalorder %s581_s7, 3 }
   0xb   : > { %s34_s8 = ssub.s32 %s711_s27, %s889_s5  ;;  %p47_p5 = por %p46_p2, %p45_p1 }
   0xc   : > { %s893_s30 = smov (%p31_p3, %s891_s30), 0  ;;  %p808_p6 = por %p187_p4, %p45_p1 }
   0xd   : > { %s33_s10 = ssub.s32 %s715_s28, %s893_s30  ;;  %s38_s12 = sadd.s32 1, %s699_s24 }
   0xe   : > { %s35_s11 = sor.u32 %s34_s8, %s33_s10  ;;  %p584_p8 = scmp.ge.s32.totalorder %s719_s29, 4 }
   0xf   : > { %p36_p7 = scmp.eq.s32.totalorder %s35_s11, 0 }
  0x10   : > { %221 = sbr.rel (%p584_p8) target bundleno = 31 (0x1f), region = 32 }
  0x11   : > { %s816_s13 = scalar_select %p36_p7, %s699_s24, %s38_s12  }
  0x15   : > { %224 = sbr.rel (!%p47_p5) target bundleno = 31 (0x1f), region = 36  ;;  %s226_s14 = sand.u32 (%p47_p5), 1, %s699_s24  }
  0x16   : > { %s586_s15 = sshll.u32 (%p47_p5), %s715_s28, 3  ;;  %s585_s16 = sshll.u32 (%p47_p5), %s226_s14, 5 }
  0x17   : > { %s230_s17 = sadd.s32 (%p47_p5), %s711_s27, %s586_s15  ;;  %s228_s22 = scalar_lea.vmem (%p47_p5), [#allocation3], %s585_s16 }
  0x18   : > { %s587_s18 = sshll.u32 (%p47_p5), %s230_s17, 3 }
  0x19   : > { %s232_s21 = scalar_lea.vmem (%p47_p5), %s874_s0, %s587_s18 }
  0x1a   : > { %v267_v0 = vld [vmem:[%s232_s21] sm:$0xff]  ;;  %v269_v1 = vld [vmem:[%s232_s21 + $0x10] sm:$0xff] }
  0x1b   : > { %v271_v2 = vld [vmem:[%s232_s21 + $0x20] sm:$0xff]  ;;  %268 = vst [vmem:[%s228_s22] sm:$0xff] %v267_v0  ;;  %v273_v3 = vld [vmem:[%s232_s21 + $0x30] sm:$0xff] }
  0x1c   : > { %270 = vst [vmem:[%s228_s22 + $0x8] sm:$0xff] %v269_v1 }
  0x1d   : > { %272 = vst [vmem:[%s228_s22 + $0x10] sm:$0xff] %v271_v2 }
  0x1e   : > { %274 = vst [vmem:[%s228_s22 + $0x18] sm:$0xff] %v273_v3 }
  0x1f PF: > { %p588_p9 = scmp.ge.s32.totalorder %s719_s29, 1  ;;  %p287_p10 = scmp.lt.s32.totalorder %s719_s29, 5 }
  0x21   : > { %p288_p11 = pnand %p588_p9, %p287_p10 }
  0x22   : > { %p327_p12 = scmp.lt.s32.totalorder (!%p288_p11), %s707_s26, 1  ;;  %s294_s16 = sand.u32 (!%p288_p11), 1, %s695_s23  }
  0x23   : > { %291 = sbr.rel (%p288_p11) target bundleno = 364 (0x16c), region = 78  ;;  %s839_s19 = sshll.u32 (!%p288_p11), %s294_s16, 5 }
  0x24   : > { %s296_s20 = scalar_lea.vmem (!%p288_p11), [#allocation3], %s839_s19  ;;  %s411_s22 = sld [smem:[#allocation2]] (!%p288_p11) }
  0x28   : > { %v721_v4 = vmov 0   ;;  %s328_s7 = scalar_select %p327_p12, %s707_s26, 1  ;;  %v365_v9 = vld [vmem:[%s877_s3] sm:$0xf]  ;;  %v335_v11 = vld [vmem:[%s296_s20 + $0x18] sm:$0xff]  ;;  %v334_v15 = vld [vmem:[%s296_s20 + $0x10] sm:$0xff] }
  0x29   : > { %659 = vset.pattern.permute.xlu1 %v721_v4  ;;  %658 = vset.pattern.permute.xlu0 %v721_v4  ;;  %v396_v10 = vld [vmem:[%s878_s4] sm:$0xf]  ;;  %v333_v16 = vld [vmem:[%s296_s20 + $0x8] sm:$0xff]  ;;  %vm371_vm0 = vcmask 261120   ;;  %vm403_vm1 = vcmask 1043456  }
  0x2a   : > { %660 = vset.pattern.permute.xlu2 %v721_v4  ;;  %s600_s8 = sshll.u32 %s328_s7, 5  ;;  %v332_v20 = vld [vmem:[%s296_s20] sm:$0xff]  ;;  %v412_v36 = vstv %s411_s22  ;;  %s326_s7 = scalar_lea.vmem [#allocation4], %s839_s19 }
  0x2b   : > { %s331_s12 = scalar_lea.vmem %s875_s1, %s600_s8  ;;  %368 = vperm.xlu2 %660, %v365_v9   ;;  %v364_v23 = vld [vmem:[%s876_s2] sm:$0xf]  ;;  %s596_s8 = sshll.u32 (%p808_p6), %s707_s26, 3 }
  0x2c   : > { %v339_v5 = vld [vmem:[%s331_s12 + $0x18] sm:$0xff]  ;;  %v337_v6 = vld [vmem:[%s331_s12 + $0x8] sm:$0xff]  ;;  %v338_v7 = vld [vmem:[%s331_s12 + $0x10] sm:$0xff]  ;;  %s449_s10 = sadd.s32 (%p808_p6), %s703_s25, %s596_s8 }
  0x2d   : > { %357 = vperm.xlu0 %658, %v339_v5   ;;  %347 = vperm.xlu1 %659, %v337_v6   ;;  %v336_v8 = vld [vmem:[%s331_s12] sm:$0xff]  ;;  %s597_s11 = sshll.u32 (%p808_p6), %s449_s10, 3 }
  0x2e   : > { %s451_s15 = scalar_lea.vmem (%p808_p6), %s880_s6, %s597_s11 }
  0x33   : > { %399 = vperm.xlu2 %660, %v396_v10  }
  0x35   : > { %352 = vperm.xlu0 %658, %v338_v7   ;;  %342 = vperm.xlu1 %659, %v336_v8  }
  0x85   : > { %v369_v24 = vpop.permute.xlu2 %368 }
  0x8d   : > { %v400_v28 = vpop.permute.xlu2 %399 }
  0x9f   : > { %v358_v12 = vpop.permute.xlu0 %357  ;;  %v348_v13 = vpop.permute.xlu1 %347 }
  0xa0   : > { %v363_v14 = vmul.f32 %v358_v12, %v335_v11  ;;  %v361_v21 = vmul.f32 %v348_v13, %v333_v16 }
  0xa2   : > { %387 = vmatpush.msra.mxu0 %v363_v14 }
  0xa7   : > { %v353_v17 = vpop.permute.xlu0 %352  ;;  %v343_v19 = vpop.permute.xlu1 %342 }
  0xa8   : > { %v362_v18 = vmul.f32 %v353_v17, %v334_v15  ;;  %v360_v22 = vmul.f32 %v343_v19, %v332_v20 }
  0xaa   : > { %388 = vmatpush.msra.mxu0 %v362_v18 }
  0xac   : > { %389 = vmatpush.msra.mxu0 %v361_v21 }
  0xae   : > { %390 = vmatpush.msra.mxu0 %v360_v22 }
  0xaf   : > { %593 = vmatmul.msk.f32.vlgmr.msra.gmra.mxu0 %vm371_vm0, %v364_v23 }
 0x12c   : > { %v392_v25 = vpop.f32.mrf.mxu0 }
 0x12d   : > { %v393_v26 = vadd.f32 %v392_v25, %v369_v24 }
 0x12f   : > { %v395_v27 = vmax.f32 %v393_v26, 0.0 }
 0x131   : > { %v402_v29 = vmul.f32 %v400_v28, %v395_v27 }
 0x133   : > { %v404_v30 = vsel %vm403_vm1, %v402_v29, 0.0 }
 0x134   : > { %v405_v31 = vrot.slane %v404_v30, 4 }
 0x136   : > { %v406_v32 = vadd.f32 %v405_v31, %v404_v30 }
 0x138   : > { %v407_v33 = vrot.slane %v406_v32, 2 }
 0x13a   : > { %v408_v34 = vadd.f32 %v407_v33, %v406_v32 }
 0x13c   : > { %v409_v35 = vrot.slane %v408_v34, 1 }
 0x13e   : > { %v410_v37 = vadd.f32 %v409_v35, %v408_v34 }
 0x140   : > { %v413_v38 = vadd.f32 %v412_v36, %v410_v37 }
 0x142   : > { %v594_v39 = vmul.f32 -1.442695, %v413_v38 }
 0x144   : > { %661 = vpow2.f32 %v594_v39 }
 0x14a   : > { %v662_v40 = vpop.eup %661 }
 0x14b   : > { %v417_v41 = vadd.f32 1.0, %v662_v40 }
 0x14d   : > { %663 = vrcp.f32 %v417_v41  ;;  %v429_v45 = vand.u32 2147483648, %v417_v41  ;;  %v427_v47 = vand.u32 2147483647, %v417_v41  ;;  %vm423_vm3 = vweird.f32 %v417_v41 }
 0x14f   : > { %v430_v49 = vor.u32 1.1754944e-38, %v429_v45  ;;  %vm428_vm5 = vcmp.eq.f32.partialorder %v427_v47, 8.507059e+37 }
 0x153   : > { %v664_v42 = vpop.eup %663 }
 0x154   : > { %v419_v43 = vmul.f32 %v664_v42, %v417_v41  ;;  %vm424_vm2 = vweird.f32 %v664_v42 }
 0x155   : > { %vm425_vm4 = vmor %vm423_vm3, %vm424_vm2 }
 0x156   : > { %v420_v44 = vsub.f32 1.0, %v419_v43 }
 0x158   : > { %v421_v46 = vmul.f32 %v664_v42, %v420_v44 }
 0x15a   : > { %v422_v48 = vadd.f32 %v664_v42, %v421_v46 }
 0x15c   : > { %v426_v50 = vsel %vm425_vm4, %v664_v42, %v422_v48 }
 0x15d   : > { %v431_v51 = vsel %vm428_vm5, %v430_v49, %v426_v50 }
 0x15e   : > { %v433_v52 = vmul.f32 %v431_v51, %v360_v22  ;;  %v434_v53 = vmul.f32 %v431_v51, %v361_v21  ;;  %v435_v54 = vmul.f32 %v431_v51, %v362_v18  ;;  %v436_v55 = vmul.f32 %v431_v51, %v363_v14 }
 0x15f   : > { %447 = sbr.rel (!%p808_p6) target bundleno = 364 (0x16c), region = 86 }
 0x160   : > { %437 = vst [vmem:[%s326_s7] sm:$0xff] %v433_v52 }
 0x161   : > { %438 = vst [vmem:[%s326_s7 + $0x8] sm:$0xff] %v434_v53 }
 0x162   : > { %439 = vst [vmem:[%s326_s7 + $0x10] sm:$0xff] %v435_v54 }
 0x163   : > { %440 = vst [vmem:[%s326_s7 + $0x18] sm:$0xff] %v436_v55 }
 0x167   : > { %v486_v56 = vld [vmem:[%s326_s7] sm:$0xff] }
 0x168   : > { %v488_v57 = vld [vmem:[%s326_s7 + $0x8] sm:$0xff]  ;;  %487 = vst [vmem:[%s451_s15] sm:$0xff] %v486_v56 }
 0x169   : > { %v490_v58 = vld [vmem:[%s326_s7 + $0x10] sm:$0xff]  ;;  %489 = vst [vmem:[%s451_s15 + $0x10] sm:$0xff] %v488_v57 }
 0x16a   : > { %v492_v59 = vld [vmem:[%s326_s7 + $0x18] sm:$0xff]  ;;  %491 = vst [vmem:[%s451_s15 + $0x20] sm:$0xff] %v490_v58 }
 0x16b   : > { %493 = vst [vmem:[%s451_s15 + $0x30] sm:$0xff] %v492_v59 }
 0x16c PF: > { %s17_s29 = sadd.s32 1, %s719_s29   ;;  %s882_s23 = smov %s699_s24 }
 0x16d   : > { %p14_p13 = scmp.ge.s32.totalorder %s17_s29, 6   ;;  %s883_s24 = smov %s816_s13 }
 0x16e   : > { %s884_s25 = smov %s711_s27  ;;  %s885_s26 = smov %s715_s28 }
 0x16f   : > { %s886_s27 = smov %s889_s5  ;;  %s887_s28 = smov %s893_s30 }
 0x170   :  { %16 = sbr.rel (!%p14_p13) target bundleno = 6 (0x6), region = 158 }

</bundles_post_ra>
